<compile_context>
chip_gen: v5e
topology: v5e:2x2
jax: 0.10.0
libtpu: 0.0.40
codegen_flags: <defaults>
</compile_context>

<pallas_src>
import functools

import jax
import jax.numpy as jnp
from jax.experimental import pallas as pl
from jax.experimental.pallas import tpu as pltpu

LN_EPS = 1e-5  # torch.nn.LayerNorm default


# ------------------------------------------------------------------ helpers --
def _round_up(x, m):
    return ((x + m - 1) // m) * m


def _layernorm_f32(x, gamma, beta):
    mean = jnp.mean(x, axis=-1, keepdims=True)
    var = jnp.mean((x - mean) ** 2, axis=-1, keepdims=True)   # biased, like torch
    return (x - mean) * jax.lax.rsqrt(var + LN_EPS) * gamma + beta


def _gelu_f32(x, exact):
    if exact:
        # exact (erf) GELU — matches torch.nn.GELU default bit-for-bit
        return 0.5 * x * (1.0 + jax.lax.erf(x * (2.0 ** -0.5)))
    # tanh-approximate GELU: runs on the EUP slot, free while the MXU is busy
    return jax.nn.gelu(x, approximate=True)


def _const_spec(shape, grid_rank):
    zeros = (0,) * len(shape)
    if grid_rank == 1:
        return pl.BlockSpec(shape, lambda b: zeros)
    return pl.BlockSpec(shape, lambda b, h: zeros)


def _default_bf16_exp():
    """bf16 EUP exists on v6e / v7x; keep f32 transcendentals on v5 and older."""
    try:
        kind = jax.devices()[0].device_kind.lower()
    except Exception:
        return False
    return not any(t in kind for t in ("v2", "v3", "v4", "v5"))


def _vmem_cap_bytes():
    """Generation-aware cap (~0.75x physical VMEM), conservative fallback."""
    try:
        cap = int(pltpu.get_tpu_info().vmem_capacity_bytes)
    except Exception:
        cap = 64 * 1024 * 1024        # v7x per-TC physical VMEM
    return cap * 3 // 4


def _compiler_params(vmem_estimate_bytes, semantics):
    kwargs = dict(dimension_semantics=semantics)
    # Only raise the scoped-VMEM limit when the estimated resident set needs it
    # (the default scoped limit is ~16 MiB on v5e / 32 MiB on v6e/v7x).
    if vmem_estimate_bytes > 16 * 1024 * 1024:
        kwargs["vmem_limit_bytes"] = int(
            min(max(vmem_estimate_bytes * 3 // 2, 32 * 1024 * 1024),
                _vmem_cap_bytes()))
    return pltpu.CompilerParams(**kwargs)


# ---------------------------------------------------------------- attention --
def _attn_kernel(x_ref, g_ref, b_ref, wqkv_ref, wp_ref, bp_ref, o_ref,
                 xn_sc, acc_sc, *, hd, hd_pad, use_ones_col, bf16_exp):
    h = pl.program_id(1)

    @pl.when(h == 0)
    def _():
        # LayerNorm once per batch step, reused by all heads; zero accumulator.
        x0 = x_ref[0].astype(jnp.float32)
        xn_sc[...] = _layernorm_f32(x0, g_ref[...], b_ref[...]).astype(jnp.bfloat16)
        acc_sc[...] = jnp.zeros_like(acc_sc)

    xn16 = xn_sc[...]                                               # (N, C) bf16

    # fused q/k/v: one (N, C) @ (C, 3*hd_pad) MXU pass; slices are 128-aligned
    qkv = jnp.dot(xn16, wqkv_ref[0], preferred_element_type=jnp.float32)
    q = qkv[:, :hd_pad]                       # softmax scale folded into Wq
    k = qkv[:, hd_pad:2 * hd_pad]
    v = qkv[:, 2 * hd_pad:]

    if use_ones_col:
        # Softmax denominator from the MXU: set padded lane `hd` of v to 1 so
        # that lane of p @ v equals sum(p, axis=-1).  (lanes > hd stay zero.)
        lane = jax.lax.broadcasted_iota(jnp.int32, v.shape, 1)
        v = jnp.where(lane == hd, 1.0, v)

    # q @ k^T (bf16 MXU inputs, f32 accumulation)
    s = jax.lax.dot_general(q.astype(jnp.bfloat16), k.astype(jnp.bfloat16),
                            (((1,), (1,)), ((), ())),
                            preferred_element_type=jnp.float32)     # (N, N)
    s = s - jnp.max(s, axis=-1, keepdims=True)                      # f32 stability
    if bf16_exp:
        p = jnp.exp(s.astype(jnp.bfloat16))                         # bf16 EUP
    else:
        p = jnp.exp(s).astype(jnp.bfloat16)                         # f32 EUP (v5e)

    pv = jnp.dot(p, v.astype(jnp.bfloat16),
                 preferred_element_type=jnp.float32)                # (N, hd_pad)
    if use_ones_col:
        rs = pv[:, hd:hd + 1]                                       # row sums of p
    else:
        rs = jnp.sum(p, axis=-1, keepdims=True, dtype=jnp.float32)

    # normalize the small (N, hd_pad) result; lane hd becomes ~1 but the
    # corresponding (zero-padded) row of Wp kills it in the projection.
    out_h = pv * pl.reciprocal(rs, approx=True)

    acc_sc[...] += jnp.dot(out_h.astype(jnp.bfloat16), wp_ref[0],
                           preferred_element_type=jnp.float32)      # (N, C)

    @pl.when(h == pl.num_programs(1) - 1)
    def _():
        x0 = x_ref[0].astype(jnp.float32)
        o_ref[0] = (x0 + acc_sc[...] + bp_ref[...]).astype(o_ref.dtype)


def attention_block(x, p, bf16_exp):
    B, N, C = x.shape
    H, _, three_hd = p["w_qkv_h"].shape
    hd, hd_pad = p["head_dim"], p["head_dim_pad"]
    kern = functools.partial(_attn_kernel, hd=hd, hd_pad=hd_pad,
                             use_ones_col=p["use_ones_col"], bf16_exp=bf16_exp)

    # resident-VMEM estimate from actual block shapes x buffer counts
    vmem_est = (2 * 2 * N * C * 4                               # x in + out blocks
                + 2 * (C * three_hd + hd_pad * C) * 2           # per-head weights
                + N * C * (2 + 4)                               # xn + acc scratch
                + N * three_hd * 4                              # fused qkv temp
                + 2 * N * N * 4 + 2 * N * hd_pad * 4)           # scores / pv temps

    return pl.pallas_call(
        kern,
        out_shape=jax.ShapeDtypeStruct((B, N, C), x.dtype),
        grid=(B, H),
        in_specs=[
            pl.BlockSpec((1, N, C), lambda b, h: (b, 0, 0)),
            _const_spec((1, C), 2), _const_spec((1, C), 2),     # ln1 gamma / beta
            pl.BlockSpec((1, C, three_hd), lambda b, h: (h, 0, 0)),   # fused Wqkv
            pl.BlockSpec((1, hd_pad, C), lambda b, h: (h, 0, 0)),     # Wproj[h]
            _const_spec((1, C), 2),                             # proj bias
        ],
        out_specs=pl.BlockSpec((1, N, C), lambda b, h: (b, 0, 0)),
        scratch_shapes=[pltpu.VMEM((N, C), jnp.bfloat16),       # LayerNorm(x)
                        pltpu.VMEM((N, C), jnp.float32)],       # head accumulator
        compiler_params=_compiler_params(vmem_est, ("parallel", "arbitrary")),
    )(x, p["ln1_g"], p["ln1_b"], p["w_qkv_h"], p["w_proj_h"], p["b_proj"])


# --------------------------------------------------------- fused dual MLP ----
def _dual_mlp_kernel(x_ref,
                     g2_ref, b2_ref, w11_ref, b11_ref, w12_ref, b12_ref,
                     g3_ref, b3_ref, w21_ref, b21_ref, w22_ref, b22_ref,
                     o_ref, *, num_imgs, prefix, exact_gelu):
    x = x_ref[0].astype(jnp.float32)                            # (N, C)
    N = x.shape[0]

    def one_mlp(xs, g, b, w1, b1, w2, b2):
        xn = _layernorm_f32(xs, g, b).astype(jnp.bfloat16)      # bf16 MXU input
        hidden = jnp.dot(xn, w1, preferred_element_type=jnp.float32) + b1
        hidden = _gelu_f32(hidden, exact_gelu).astype(jnp.bfloat16)
        return xs + jnp.dot(hidden, w2, preferred_element_type=jnp.float32) + b2

    # mlp2 over the full token tile; mlp1 only over the 8-row-aligned prefix.
    # Both slices / stores are sublane-aligned -> no relayout, no masked stores.
    y2 = one_mlp(x, g3_ref[...], b3_ref[...],
                 w21_ref[...], b21_ref[...], w22_ref[...], b22_ref[...])  # (N, C)
    y1 = one_mlp(x[:prefix], g2_ref[...], b2_ref[...],
                 w11_ref[...], b11_ref[...], w12_ref[...], b12_ref[...])  # (P, C)

    row = jax.lax.broadcasted_iota(jnp.int32, (prefix, 1), 0)
    o_ref[0, :prefix] = jnp.where(row < num_imgs, y1, y2[:prefix]).astype(o_ref.dtype)
    if prefix < N:
        o_ref[0, prefix:] = y2[prefix:].astype(o_ref.dtype)


def dual_mlp_block(x, p, num_imgs, exact_gelu=False):
    B, N, C = x.shape
    Hd = p["mlp1_w1"].shape[1]
    assert 0 < num_imgs < N, "num_imgs must split the token axis"
    prefix = min(_round_up(num_imgs, 8), N)   # sublane-aligned mlp1 prefix
    kern = functools.partial(_dual_mlp_kernel, num_imgs=num_imgs, prefix=prefix,
                             exact_gelu=exact_gelu)

    vmem_est = (2 * 2 * N * C * 4                               # x in + out blocks
                + 2 * 2 * (C * Hd + Hd * C) * 2                 # both MLP weights
                + 2 * N * Hd * 4 + 2 * N * C * 4)               # hidden / residual

    cs = lambda shape: _const_spec(shape, 1)
    return pl.pallas_call(
        kern,
        out_shape=jax.ShapeDtypeStruct((B, N, C), x.dtype),
        grid=(B,),
        in_specs=[
            pl.BlockSpec((1, N, C), lambda b: (b, 0, 0)),
            cs((1, C)), cs((1, C)),                             # ln2 gamma / beta
            cs((C, Hd)), cs((1, Hd)), cs((Hd, C)), cs((1, C)),  # mlp1
            cs((1, C)), cs((1, C)),                             # ln3 gamma / beta
            cs((C, Hd)), cs((1, Hd)), cs((Hd, C)), cs((1, C)),  # mlp2
        ],
        out_specs=pl.BlockSpec((1, N, C), lambda b: (b, 0, 0)),
        compiler_params=_compiler_params(vmem_est, ("parallel",)),
    )(x,
      p["ln2_g"], p["ln2_b"], p["mlp1_w1"], p["mlp1_b1"], p["mlp1_w2"], p["mlp1_b2"],
      p["ln3_g"], p["ln3_b"], p["mlp2_w1"], p["mlp2_b1"], p["mlp2_w2"], p["mlp2_b2"])


# -------------------------------------------------------------- MixedBlock --
def mixed_block(x, kparams, num_imgs=3, exact_gelu=False, bf16_exp=None):
    if bf16_exp is None:
        bf16_exp = _default_bf16_exp()
    x = attention_block(x, kparams, bf16_exp=bf16_exp)
    return dual_mlp_block(x, kparams, num_imgs, exact_gelu=exact_gelu)


# -------------------------------------------------------- params / weights --
def init_params(key, dim, mlp_ratio=4.0):
    """Torch-layout f32 parameters (weights stored (in, out))."""
    hidden = int(dim * mlp_ratio)
    ks = jax.random.split(key, 6)

    def w(k, shape):
        return (0.02 * jax.random.normal(k, shape)).astype(jnp.float32)

    ones = lambda n: jnp.ones((1, n), jnp.float32)
    zeros = lambda n: jnp.zeros((1, n), jnp.float32)
    return dict(
        ln1_g=ones(dim), ln1_b=zeros(dim),
        w_qkv=w(ks[0], (dim, 3 * dim)),                    # qkv_bias=False
        w_proj=w(ks[1], (dim, dim)), b_proj=zeros(dim),
        ln2_g=ones(dim), ln2_b=zeros(dim),
        mlp1_w1=w(ks[2], (dim, hidden)), mlp1_b1=zeros(hidden),
        mlp1_w2=w(ks[3], (hidden, dim)), mlp1_b2=zeros(dim),
        ln3_g=ones(dim), ln3_b=zeros(dim),
        mlp2_w1=w(ks[4], (dim, hidden)), mlp2_b1=zeros(hidden),
        mlp2_w2=w(ks[5], (hidden, dim)), mlp2_b2=zeros(dim),
    )


def prepare_kernel_params(params, num_heads):
    """One-time host-side prep.

    Per-head fused (C, 3*hd_pad) qkv weights (softmax scale folded into Wq),
    per-head (hd_pad, C) projection weights, head dim zero-padded to a multiple
    of 128 lanes, all matmul weights cast to bf16.  Matches the torch Attention
    layout: qkv columns are [q | k | v], each split head-major into hd-wide
    groups; proj rows are head-major.
    """
    C = params["w_proj"].shape[0]
    hd = C // num_heads
    assert hd * num_heads == C
    hd_pad = _round_up(hd, 128)
    use_ones_col = hd_pad > hd            # spare lane for the ones-column trick
    scale = hd ** -0.5
    bf = lambda a: a.astype(jnp.bfloat16)

    wqkv = params["w_qkv"].astype(jnp.float32)

    def per_head(block, s=1.0):
        w = block.reshape(C, num_heads, hd).transpose(1, 0, 2) * s   # (H, C, hd)
        return jnp.pad(w, ((0, 0), (0, 0), (0, hd_pad - hd)))        # zero lanes

    wq = per_head(wqkv[:, :C], scale)
    wk = per_head(wqkv[:, C:2 * C])
    wv = per_head(wqkv[:, 2 * C:])
    w_qkv_h = jnp.concatenate([wq, wk, wv], axis=-1)                 # (H, C, 3*hd_pad)

    wp = params["w_proj"].astype(jnp.float32).reshape(num_heads, hd, C)
    wp = jnp.pad(wp, ((0, 0), (0, hd_pad - hd), (0, 0)))             # (H, hd_pad, C)

    return dict(
        ln1_g=params["ln1_g"], ln1_b=params["ln1_b"],
        w_qkv_h=bf(w_qkv_h), w_proj_h=bf(wp), b_proj=params["b_proj"],
        head_dim=hd, head_dim_pad=hd_pad, use_ones_col=use_ones_col,
        ln2_g=params["ln2_g"], ln2_b=params["ln2_b"],
        mlp1_w1=bf(params["mlp1_w1"]), mlp1_b1=params["mlp1_b1"],
        mlp1_w2=bf(params["mlp1_w2"]), mlp1_b2=params["mlp1_b2"],
        ln3_g=params["ln3_g"], ln3_b=params["ln3_b"],
        mlp2_w1=bf(params["mlp2_w1"]), mlp2_b1=params["mlp2_b1"],
        mlp2_w2=bf(params["mlp2_w2"]), mlp2_b2=params["mlp2_b2"],
    )


# --------------------------------------------------------------------- main --
if __name__ == "__main__":
    B, N, C, num_heads, num_imgs = 2, 8, 32, 4, 3
    key = jax.random.PRNGKey(0)
    kx, kprm = jax.random.split(key)
    x = jax.random.normal(kx, (B, N, C), dtype=jnp.float32)
    params = init_params(kprm, C)
    kparams = prepare_kernel_params(params, num_heads)

    try:
        out = jax.block_until_ready(mixed_block(x, kparams, num_imgs=num_imgs))
    except Exception:
        # conservative retry: f32 softmax exp (older-gen / unexpected lowering gap)
        out = jax.block_until_ready(
            mixed_block(x, kparams, num_imgs=num_imgs, bf16_exp=False))

    assert out.shape == (B, N, C), out.shape
    assert jnp.all(jnp.isfinite(out))
    print("KERNEL_OK")
</pallas_src>

<mosaic_0001>
module attributes {stable_mosaic.version = 11 : i64} {
  func.func @_attn_kernel(%arg0: i32, %arg1: i32, %arg2: memref<1x8x32xf32, #tpu.memory_space<vmem>>, %arg3: memref<1x32xf32, #tpu.memory_space<vmem>>, %arg4: memref<1x32xf32, #tpu.memory_space<vmem>>, %arg5: memref<1x32x384xbf16, #tpu.memory_space<vmem>>, %arg6: memref<1x128x32xbf16, #tpu.memory_space<vmem>>, %arg7: memref<1x32xf32, #tpu.memory_space<vmem>>, %arg8: memref<1x8x32xf32, #tpu.memory_space<vmem>>, %arg9: memref<8x32xbf16, #tpu.memory_space<vmem>>, %arg10: memref<8x32xf32, #tpu.memory_space<vmem>>) attributes {dimension_semantics = [#tpu.dimension_semantics<parallel>, #tpu.dimension_semantics<arbitrary>], iteration_bounds = array<i64: 2, 4>, scalar_prefetch = 0 : i64, scratch_operands = 2 : i64, tpu.core_type = #tpu.core_type<tc>, window_params = [{transform_indices = @transform_0, window_bounds = array<i64: 1, 8, 32>}, {pipeline_mode = #tpu.pipeline_mode<synchronous>, transform_indices = @transform_1, window_bounds = array<i64: 1, 32>}, {pipeline_mode = #tpu.pipeline_mode<synchronous>, transform_indices = @transform_2, window_bounds = array<i64: 1, 32>}, {transform_indices = @transform_3, window_bounds = array<i64: 1, 32, 384>}, {transform_indices = @transform_4, window_bounds = array<i64: 1, 128, 32>}, {pipeline_mode = #tpu.pipeline_mode<synchronous>, transform_indices = @transform_5, window_bounds = array<i64: 1, 32>}, {transform_indices = @transform_6, window_bounds = array<i64: 1, 8, 32>}]} {
    %c0_i32 = arith.constant 0 : i32
    %0 = arith.cmpi eq, %arg1, %c0_i32 : i32
    %1 = arith.extui %0 : i1 to i32
    %c0_i32_0 = arith.constant 0 : i32
    %2 = arith.cmpi ne, %1, %c0_i32_0 : i32
    scf.if %2 {
      %c0_18 = arith.constant 0 : index
      %c0_19 = arith.constant 0 : index
      %c0_20 = arith.constant 0 : index
      %40 = vector.load %arg2[%c0_18, %c0_19, %c0_20] : memref<1x8x32xf32, #tpu.memory_space<vmem>>, vector<1x8x32xf32>
      %41 = vector.shape_cast %40 : vector<1x8x32xf32> to vector<8x32xf32>
      %c0_21 = arith.constant 0 : index
      %c0_22 = arith.constant 0 : index
      %42 = vector.load %arg3[%c0_21, %c0_22] : memref<1x32xf32, #tpu.memory_space<vmem>>, vector<1x32xf32>
      %c0_23 = arith.constant 0 : index
      %c0_24 = arith.constant 0 : index
      %43 = vector.load %arg4[%c0_23, %c0_24] : memref<1x32xf32, #tpu.memory_space<vmem>>, vector<1x32xf32>
      %cst_25 = arith.constant dense<0.000000e+00> : vector<8xf32>
      %44 = vector.multi_reduction <add>, %41, %cst_25 [1] : vector<8x32xf32> to vector<8xf32>
      %45 = vector.shape_cast %44 : vector<8xf32> to vector<8x1xf32>
      %cst_26 = arith.constant 3.200000e+01 : f32
      %46 = vector.broadcast %cst_26 : f32 to vector<8x1xf32>
      %47 = arith.divf %45, %46 : vector<8x1xf32>
      %48 = vector.broadcast %47 : vector<8x1xf32> to vector<8x32xf32>
      %49 = arith.subf %41, %48 : vector<8x32xf32>
      %50 = arith.mulf %49, %49 : vector<8x32xf32>
      %cst_27 = arith.constant dense<0.000000e+00> : vector<8xf32>
      %51 = vector.multi_reduction <add>, %50, %cst_27 [1] : vector<8x32xf32> to vector<8xf32>
      %52 = vector.shape_cast %51 : vector<8xf32> to vector<8x1xf32>
      %cst_28 = arith.constant 3.200000e+01 : f32
      %53 = vector.broadcast %cst_28 : f32 to vector<8x1xf32>
      %54 = arith.divf %52, %53 : vector<8x1xf32>
      %55 = vector.broadcast %47 : vector<8x1xf32> to vector<8x32xf32>
      %56 = arith.subf %41, %55 : vector<8x32xf32>
      %cst_29 = arith.constant 9.99999974E-6 : f32
      %57 = vector.broadcast %cst_29 : f32 to vector<8x1xf32>
      %58 = arith.addf %54, %57 : vector<8x1xf32>
      %59 = math.rsqrt %58 : vector<8x1xf32>
      %60 = vector.broadcast %59 : vector<8x1xf32> to vector<8x32xf32>
      %61 = arith.mulf %56, %60 : vector<8x32xf32>
      %62 = vector.broadcast %42 : vector<1x32xf32> to vector<8x32xf32>
      %63 = arith.mulf %61, %62 : vector<8x32xf32>
      %64 = vector.broadcast %43 : vector<1x32xf32> to vector<8x32xf32>
      %65 = arith.addf %63, %64 : vector<8x32xf32>
      %66 = arith.truncf %65 : vector<8x32xf32> to vector<8x32xbf16>
      %c0_30 = arith.constant 0 : index
      %c0_31 = arith.constant 0 : index
      %67 = vector.load %arg9[%c0_30, %c0_31] : memref<8x32xbf16, #tpu.memory_space<vmem>>, vector<8x32xbf16>
      tpu.vector_store %arg9[%c0_30, %c0_31], %66 {strides = array<i32>} : memref<8x32xbf16, #tpu.memory_space<vmem>>, vector<8x32xbf16>,
      %cst_32 = arith.constant 0.000000e+00 : f32
      %68 = vector.broadcast %cst_32 : f32 to vector<8x32xf32>
      %c0_33 = arith.constant 0 : index
      %c0_34 = arith.constant 0 : index
      %69 = vector.load %arg10[%c0_33, %c0_34] : memref<8x32xf32, #tpu.memory_space<vmem>>, vector<8x32xf32>
      tpu.vector_store %arg10[%c0_33, %c0_34], %68 {strides = array<i32>} : memref<8x32xf32, #tpu.memory_space<vmem>>, vector<8x32xf32>,
    } else {
    }
    %c0 = arith.constant 0 : index
    %c0_1 = arith.constant 0 : index
    %3 = vector.load %arg9[%c0, %c0_1] : memref<8x32xbf16, #tpu.memory_space<vmem>>, vector<8x32xbf16>
    %c0_2 = arith.constant 0 : index
    %c0_3 = arith.constant 0 : index
    %c0_4 = arith.constant 0 : index
    %4 = vector.load %arg5[%c0_2, %c0_3, %c0_4] : memref<1x32x384xbf16, #tpu.memory_space<vmem>>, vector<1x32x384xbf16>
    %5 = vector.shape_cast %4 : vector<1x32x384xbf16> to vector<32x384xbf16>
    %cst = arith.constant dense<0.000000e+00> : vector<8x384xf32>
    %6 = tpu.matmul %3, %5, %cst {dimension_numbers = #tpu.dot_dimension_numbers<[1], [0], [0], [1], [0, 0, 1, 1], [], []>} : vector<8x32xbf16>, vector<32x384xbf16>, vector<8x384xf32> -> vector<8x384xf32>
    %7 = vector.extract_strided_slice %6 {offsets = [0, 0], sizes = [8, 128], strides = [1, 1]} : vector<8x384xf32> to vector<8x128xf32>
    %8 = vector.extract_strided_slice %6 {offsets = [0, 128], sizes = [8, 128], strides = [1, 1]} : vector<8x384xf32> to vector<8x128xf32>
    %9 = vector.extract_strided_slice %6 {offsets = [0, 256], sizes = [8, 128], strides = [1, 1]} : vector<8x384xf32> to vector<8x128xf32>
    %10 = tpu.iota {dimensions = array<i32: 1>} : vector<8x128xi32>
    %c8_i32 = arith.constant 8 : i32
    %11 = vector.broadcast %c8_i32 : i32 to vector<8x128xi32>
    %12 = arith.cmpi eq, %10, %11 : vector<8x128xi32>
    %cst_5 = arith.constant 1.000000e+00 : f32
    %13 = vector.broadcast %cst_5 : f32 to vector<8x128xf32>
    %14 = arith.select %12, %13, %9 : vector<8x128xi1>, vector<8x128xf32>
    %15 = arith.truncf %7 : vector<8x128xf32> to vector<8x128xbf16>
    %16 = arith.truncf %8 : vector<8x128xf32> to vector<8x128xbf16>
    %cst_6 = arith.constant dense<0.000000e+00> : vector<8x8xf32>
    %17 = tpu.matmul %15, %16, %cst_6 {dimension_numbers = #tpu.dot_dimension_numbers<[1], [1], [0], [0], [0, 0, 1, 0], [], []>} : vector<8x128xbf16>, vector<8x128xbf16>, vector<8x8xf32> -> vector<8x8xf32>
    %cst_7 = arith.constant dense<0xFF800000> : vector<8xf32>
    %18 = vector.multi_reduction <maximumf>, %17, %cst_7 [1] : vector<8x8xf32> to vector<8xf32>
    %19 = vector.shape_cast %18 : vector<8xf32> to vector<8x1xf32>
    %20 = vector.broadcast %19 : vector<8x1xf32> to vector<8x8xf32>
    %21 = arith.subf %17, %20 : vector<8x8xf32>
    %22 = arith.truncf %21 : vector<8x8xf32> to vector<8x8xbf16>
    %23 = math.exp %22 : vector<8x8xbf16>
    %24 = arith.truncf %14 : vector<8x128xf32> to vector<8x128xbf16>
    %cst_8 = arith.constant dense<0.000000e+00> : vector<8x128xf32>
    %25 = tpu.matmul %23, %24, %cst_8 {dimension_numbers = #tpu.dot_dimension_numbers<[1], [0], [0], [1], [0, 0, 1, 1], [], []>} : vector<8x8xbf16>, vector<8x128xbf16>, vector<8x128xf32> -> vector<8x128xf32>
    %26 = vector.extract_strided_slice %25 {offsets = [0, 8], sizes = [8, 1], strides = [1, 1]} : vector<8x128xf32> to vector<8x1xf32>
    %27 = tpu.reciprocal %26 {approx = true} : vector<8x1xf32> -> vector<8x1xf32>
    %28 = vector.broadcast %27 : vector<8x1xf32> to vector<8x128xf32>
    %29 = arith.mulf %25, %28 : vector<8x128xf32>
    %c0_9 = arith.constant 0 : index
    %c0_10 = arith.constant 0 : index
    %30 = vector.load %arg10[%c0_9, %c0_10] : memref<8x32xf32, #tpu.memory_space<vmem>>, vector<8x32xf32>
    %31 = arith.truncf %29 : vector<8x128xf32> to vector<8x128xbf16>
    %c0_11 = arith.constant 0 : index
    %c0_12 = arith.constant 0 : index
    %c0_13 = arith.constant 0 : index
    %32 = vector.load %arg6[%c0_11, %c0_12, %c0_13] : memref<1x128x32xbf16, #tpu.memory_space<vmem>>, vector<1x128x32xbf16>
    %33 = vector.shape_cast %32 : vector<1x128x32xbf16> to vector<128x32xbf16>
    %cst_14 = arith.constant dense<0.000000e+00> : vector<8x32xf32>
    %34 = tpu.matmul %31, %33, %cst_14 {dimension_numbers = #tpu.dot_dimension_numbers<[1], [0], [0], [1], [0, 0, 1, 1], [], []>} : vector<8x128xbf16>, vector<128x32xbf16>, vector<8x32xf32> -> vector<8x32xf32>
    %35 = arith.addf %30, %34 : vector<8x32xf32>
    %c0_15 = arith.constant 0 : index
    %c0_16 = arith.constant 0 : index
    %36 = vector.load %arg10[%c0_15, %c0_16] : memref<8x32xf32, #tpu.memory_space<vmem>>, vector<8x32xf32>
    tpu.vector_store %arg10[%c0_15, %c0_16], %35 {strides = array<i32>} : memref<8x32xf32, #tpu.memory_space<vmem>>, vector<8x32xf32>,
    %c3_i32 = arith.constant 3 : i32
    %37 = arith.cmpi eq, %arg1, %c3_i32 : i32
    %38 = arith.extui %37 : i1 to i32
    %c0_i32_17 = arith.constant 0 : i32
    %39 = arith.cmpi ne, %38, %c0_i32_17 : i32
    scf.if %39 {
      %c0_18 = arith.constant 0 : index
      %c0_19 = arith.constant 0 : index
      %c0_20 = arith.constant 0 : index
      %40 = vector.load %arg2[%c0_18, %c0_19, %c0_20] : memref<1x8x32xf32, #tpu.memory_space<vmem>>, vector<1x8x32xf32>
      %41 = vector.shape_cast %40 : vector<1x8x32xf32> to vector<8x32xf32>
      %c0_21 = arith.constant 0 : index
      %c0_22 = arith.constant 0 : index
      %42 = vector.load %arg10[%c0_21, %c0_22] : memref<8x32xf32, #tpu.memory_space<vmem>>, vector<8x32xf32>
      %43 = arith.addf %41, %42 : vector<8x32xf32>
      %c0_23 = arith.constant 0 : index
      %c0_24 = arith.constant 0 : index
      %44 = vector.load %arg7[%c0_23, %c0_24] : memref<1x32xf32, #tpu.memory_space<vmem>>, vector<1x32xf32>
      %45 = vector.broadcast %44 : vector<1x32xf32> to vector<8x32xf32>
      %46 = arith.addf %43, %45 : vector<8x32xf32>
      %c0_25 = arith.constant 0 : index
      %c0_26 = arith.constant 0 : index
      %c0_27 = arith.constant 0 : index
      %47 = vector.load %arg8[%c0_25, %c0_26, %c0_27] : memref<1x8x32xf32, #tpu.memory_space<vmem>>, vector<1x8x32xf32>
      %48 = vector.shape_cast %47 : vector<1x8x32xf32> to vector<8x32xf32>
      %49 = vector.shape_cast %46 : vector<8x32xf32> to vector<1x8x32xf32>
      tpu.vector_store %arg8[%c0_25, %c0_26, %c0_27], %49 {strides = array<i32>} : memref<1x8x32xf32, #tpu.memory_space<vmem>>, vector<1x8x32xf32>,
    } else {
    }
    return
  }
  func.func @transform_0(%arg0: i32, %arg1: i32) -> (i32, i32, i32) {
    %c0_i32 = arith.constant 0 : i32
    %c0_i32_0 = arith.constant 0 : i32
    %c0_i32_1 = arith.constant 0 : i32
    return %arg0, %c0_i32, %c0_i32_0 : i32, i32, i32
  }
  func.func @transform_1(%arg0: i32, %arg1: i32) -> (i32, i32) {
    %c0_i32 = arith.constant 0 : i32
    %c0_i32_0 = arith.constant 0 : i32
    %c0_i32_1 = arith.constant 0 : i32
    return %c0_i32, %c0_i32_0 : i32, i32
  }
  func.func @transform_2(%arg0: i32, %arg1: i32) -> (i32, i32) {
    %c0_i32 = arith.constant 0 : i32
    %c0_i32_0 = arith.constant 0 : i32
    %c0_i32_1 = arith.constant 0 : i32
    return %c0_i32, %c0_i32_0 : i32, i32
  }
  func.func @transform_3(%arg0: i32, %arg1: i32) -> (i32, i32, i32) {
    %c0_i32 = arith.constant 0 : i32
    %c0_i32_0 = arith.constant 0 : i32
    %c0_i32_1 = arith.constant 0 : i32
    return %arg1, %c0_i32, %c0_i32_0 : i32, i32, i32
  }
  func.func @transform_4(%arg0: i32, %arg1: i32) -> (i32, i32, i32) {
    %c0_i32 = arith.constant 0 : i32
    %c0_i32_0 = arith.constant 0 : i32
    %c0_i32_1 = arith.constant 0 : i32
    return %arg1, %c0_i32, %c0_i32_0 : i32, i32, i32
  }
  func.func @transform_5(%arg0: i32, %arg1: i32) -> (i32, i32) {
    %c0_i32 = arith.constant 0 : i32
    %c0_i32_0 = arith.constant 0 : i32
    %c0_i32_1 = arith.constant 0 : i32
    return %c0_i32, %c0_i32_0 : i32, i32
  }
  func.func @transform_6(%arg0: i32, %arg1: i32) -> (i32, i32, i32) {
    %c0_i32 = arith.constant 0 : i32
    %c0_i32_0 = arith.constant 0 : i32
    %c0_i32_1 = arith.constant 0 : i32
    return %arg0, %c0_i32, %c0_i32_0 : i32, i32, i32
  }
}

module attributes {stable_mosaic.version = 11 : i64} {
  func.func @_attn_kernel(%arg0: i32, %arg1: i32, %arg2: memref<1x8x32xf32, #tpu.memory_space<vmem>>, %arg3: memref<1x32xf32, #tpu.memory_space<vmem>>, %arg4: memref<1x32xf32, #tpu.memory_space<vmem>>, %arg5: memref<1x32x384xbf16, #tpu.memory_space<vmem>>, %arg6: memref<1x128x32xbf16, #tpu.memory_space<vmem>>, %arg7: memref<1x32xf32, #tpu.memory_space<vmem>>, %arg8: memref<1x8x32xf32, #tpu.memory_space<vmem>>, %arg9: memref<8x32xbf16, #tpu.memory_space<vmem>>, %arg10: memref<8x32xf32, #tpu.memory_space<vmem>>) attributes {dimension_semantics = [#tpu.dimension_semantics<parallel>, #tpu.dimension_semantics<arbitrary>], iteration_bounds = array<i64: 2, 4>, scalar_prefetch = 0 : i64, scratch_operands = 2 : i64, tpu.core_type = #tpu.core_type<tc>, window_params = [{transform_indices = @transform_0, window_bounds = array<i64: 1, 8, 32>}, {pipeline_mode = #tpu.pipeline_mode<synchronous>, transform_indices = @transform_1, window_bounds = array<i64: 1, 32>}, {pipeline_mode = #tpu.pipeline_mode<synchronous>, transform_indices = @transform_2, window_bounds = array<i64: 1, 32>}, {transform_indices = @transform_3, window_bounds = array<i64: 1, 32, 384>}, {transform_indices = @transform_4, window_bounds = array<i64: 1, 128, 32>}, {pipeline_mode = #tpu.pipeline_mode<synchronous>, transform_indices = @transform_5, window_bounds = array<i64: 1, 32>}, {transform_indices = @transform_6, window_bounds = array<i64: 1, 8, 32>}]} {
    %c0_i32 = arith.constant 0 : i32
    %0 = arith.cmpi eq, %arg1, %c0_i32 : i32
    %1 = arith.extui %0 : i1 to i32
    %c0_i32_0 = arith.constant 0 : i32
    %2 = arith.cmpi ne, %1, %c0_i32_0 : i32
    scf.if %2 {
      %c0_18 = arith.constant 0 : index
      %c0_19 = arith.constant 0 : index
      %c0_20 = arith.constant 0 : index
      %40 = vector.load %arg2[%c0_18, %c0_19, %c0_20] : memref<1x8x32xf32, #tpu.memory_space<vmem>>, vector<1x8x32xf32>
      %41 = vector.shape_cast %40 : vector<1x8x32xf32> to vector<8x32xf32>
      %c0_21 = arith.constant 0 : index
      %c0_22 = arith.constant 0 : index
      %42 = vector.load %arg3[%c0_21, %c0_22] : memref<1x32xf32, #tpu.memory_space<vmem>>, vector<1x32xf32>
      %c0_23 = arith.constant 0 : index
      %c0_24 = arith.constant 0 : index
      %43 = vector.load %arg4[%c0_23, %c0_24] : memref<1x32xf32, #tpu.memory_space<vmem>>, vector<1x32xf32>
      %cst_25 = arith.constant dense<0.000000e+00> : vector<8xf32>
      %44 = vector.multi_reduction <add>, %41, %cst_25 [1] : vector<8x32xf32> to vector<8xf32>
      %45 = vector.shape_cast %44 : vector<8xf32> to vector<8x1xf32>
      %cst_26 = arith.constant 3.200000e+01 : f32
      %46 = vector.broadcast %cst_26 : f32 to vector<8x1xf32>
      %47 = arith.divf %45, %46 : vector<8x1xf32>
      %48 = vector.broadcast %47 : vector<8x1xf32> to vector<8x32xf32>
      %49 = arith.subf %41, %48 : vector<8x32xf32>
      %50 = arith.mulf %49, %49 : vector<8x32xf32>
      %cst_27 = arith.constant dense<0.000000e+00> : vector<8xf32>
      %51 = vector.multi_reduction <add>, %50, %cst_27 [1] : vector<8x32xf32> to vector<8xf32>
      %52 = vector.shape_cast %51 : vector<8xf32> to vector<8x1xf32>
      %cst_28 = arith.constant 3.200000e+01 : f32
      %53 = vector.broadcast %cst_28 : f32 to vector<8x1xf32>
      %54 = arith.divf %52, %53 : vector<8x1xf32>
      %55 = vector.broadcast %47 : vector<8x1xf32> to vector<8x32xf32>
      %56 = arith.subf %41, %55 : vector<8x32xf32>
      %cst_29 = arith.constant 9.99999974E-6 : f32
      %57 = vector.broadcast %cst_29 : f32 to vector<8x1xf32>
      %58 = arith.addf %54, %57 : vector<8x1xf32>
      %59 = math.rsqrt %58 : vector<8x1xf32>
      %60 = vector.broadcast %59 : vector<8x1xf32> to vector<8x32xf32>
      %61 = arith.mulf %56, %60 : vector<8x32xf32>
      %62 = vector.broadcast %42 : vector<1x32xf32> to vector<8x32xf32>
      %63 = arith.mulf %61, %62 : vector<8x32xf32>
      %64 = vector.broadcast %43 : vector<1x32xf32> to vector<8x32xf32>
      %65 = arith.addf %63, %64 : vector<8x32xf32>
      %66 = arith.truncf %65 : vector<8x32xf32> to vector<8x32xbf16>
      %c0_30 = arith.constant 0 : index
      %c0_31 = arith.constant 0 : index
      %67 = vector.load %arg9[%c0_30, %c0_31] : memref<8x32xbf16, #tpu.memory_space<vmem>>, vector<8x32xbf16>
      tpu.vector_store %arg9[%c0_30, %c0_31], %66 {strides = array<i32>} : memref<8x32xbf16, #tpu.memory_space<vmem>>, vector<8x32xbf16>,
      %cst_32 = arith.constant 0.000000e+00 : f32
      %68 = vector.broadcast %cst_32 : f32 to vector<8x32xf32>
      %c0_33 = arith.constant 0 : index
      %c0_34 = arith.constant 0 : index
      %69 = vector.load %arg10[%c0_33, %c0_34] : memref<8x32xf32, #tpu.memory_space<vmem>>, vector<8x32xf32>
      tpu.vector_store %arg10[%c0_33, %c0_34], %68 {strides = array<i32>} : memref<8x32xf32, #tpu.memory_space<vmem>>, vector<8x32xf32>,
    } else {
    }
    %c0 = arith.constant 0 : index
    %c0_1 = arith.constant 0 : index
    %3 = vector.load %arg9[%c0, %c0_1] : memref<8x32xbf16, #tpu.memory_space<vmem>>, vector<8x32xbf16>
    %c0_2 = arith.constant 0 : index
    %c0_3 = arith.constant 0 : index
    %c0_4 = arith.constant 0 : index
    %4 = vector.load %arg5[%c0_2, %c0_3, %c0_4] : memref<1x32x384xbf16, #tpu.memory_space<vmem>>, vector<1x32x384xbf16>
    %5 = vector.shape_cast %4 : vector<1x32x384xbf16> to vector<32x384xbf16>
    %cst = arith.constant dense<0.000000e+00> : vector<8x384xf32>
    %6 = tpu.matmul %3, %5, %cst {dimension_numbers = #tpu.dot_dimension_numbers<[1], [0], [0], [1], [0, 0, 1, 1], [], []>} : vector<8x32xbf16>, vector<32x384xbf16>, vector<8x384xf32> -> vector<8x384xf32>
    %7 = vector.extract_strided_slice %6 {offsets = [0, 0], sizes = [8, 128], strides = [1, 1]} : vector<8x384xf32> to vector<8x128xf32>
    %8 = vector.extract_strided_slice %6 {offsets = [0, 128], sizes = [8, 128], strides = [1, 1]} : vector<8x384xf32> to vector<8x128xf32>
    %9 = vector.extract_strided_slice %6 {offsets = [0, 256], sizes = [8, 128], strides = [1, 1]} : vector<8x384xf32> to vector<8x128xf32>
    %10 = tpu.iota {dimensions = array<i32: 1>} : vector<8x128xi32>
    %c8_i32 = arith.constant 8 : i32
    %11 = vector.broadcast %c8_i32 : i32 to vector<8x128xi32>
    %12 = arith.cmpi eq, %10, %11 : vector<8x128xi32>
    %cst_5 = arith.constant 1.000000e+00 : f32
    %13 = vector.broadcast %cst_5 : f32 to vector<8x128xf32>
    %14 = arith.select %12, %13, %9 : vector<8x128xi1>, vector<8x128xf32>
    %15 = arith.truncf %7 : vector<8x128xf32> to vector<8x128xbf16>
    %16 = arith.truncf %8 : vector<8x128xf32> to vector<8x128xbf16>
    %cst_6 = arith.constant dense<0.000000e+00> : vector<8x8xf32>
    %17 = tpu.matmul %15, %16, %cst_6 {dimension_numbers = #tpu.dot_dimension_numbers<[1], [1], [0], [0], [0, 0, 1, 0], [], []>} : vector<8x128xbf16>, vector<8x128xbf16>, vector<8x8xf32> -> vector<8x8xf32>
    %cst_7 = arith.constant dense<0xFF800000> : vector<8xf32>
    %18 = vector.multi_reduction <maximumf>, %17, %cst_7 [1] : vector<8x8xf32> to vector<8xf32>
    %19 = vector.shape_cast %18 : vector<8xf32> to vector<8x1xf32>
    %20 = vector.broadcast %19 : vector<8x1xf32> to vector<8x8xf32>
    %21 = arith.subf %17, %20 : vector<8x8xf32>
    %22 = math.exp %21 : vector<8x8xf32>
    %23 = arith.truncf %22 : vector<8x8xf32> to vector<8x8xbf16>
    %24 = arith.truncf %14 : vector<8x128xf32> to vector<8x128xbf16>
    %cst_8 = arith.constant dense<0.000000e+00> : vector<8x128xf32>
    %25 = tpu.matmul %23, %24, %cst_8 {dimension_numbers = #tpu.dot_dimension_numbers<[1], [0], [0], [1], [0, 0, 1, 1], [], []>} : vector<8x8xbf16>, vector<8x128xbf16>, vector<8x128xf32> -> vector<8x128xf32>
    %26 = vector.extract_strided_slice %25 {offsets = [0, 8], sizes = [8, 1], strides = [1, 1]} : vector<8x128xf32> to vector<8x1xf32>
    %27 = tpu.reciprocal %26 {approx = true} : vector<8x1xf32> -> vector<8x1xf32>
    %28 = vector.broadcast %27 : vector<8x1xf32> to vector<8x128xf32>
    %29 = arith.mulf %25, %28 : vector<8x128xf32>
    %c0_9 = arith.constant 0 : index
    %c0_10 = arith.constant 0 : index
    %30 = vector.load %arg10[%c0_9, %c0_10] : memref<8x32xf32, #tpu.memory_space<vmem>>, vector<8x32xf32>
    %31 = arith.truncf %29 : vector<8x128xf32> to vector<8x128xbf16>
    %c0_11 = arith.constant 0 : index
    %c0_12 = arith.constant 0 : index
    %c0_13 = arith.constant 0 : index
    %32 = vector.load %arg6[%c0_11, %c0_12, %c0_13] : memref<1x128x32xbf16, #tpu.memory_space<vmem>>, vector<1x128x32xbf16>
    %33 = vector.shape_cast %32 : vector<1x128x32xbf16> to vector<128x32xbf16>
    %cst_14 = arith.constant dense<0.000000e+00> : vector<8x32xf32>
    %34 = tpu.matmul %31, %33, %cst_14 {dimension_numbers = #tpu.dot_dimension_numbers<[1], [0], [0], [1], [0, 0, 1, 1], [], []>} : vector<8x128xbf16>, vector<128x32xbf16>, vector<8x32xf32> -> vector<8x32xf32>
    %35 = arith.addf %30, %34 : vector<8x32xf32>
    %c0_15 = arith.constant 0 : index
    %c0_16 = arith.constant 0 : index
    %36 = vector.load %arg10[%c0_15, %c0_16] : memref<8x32xf32, #tpu.memory_space<vmem>>, vector<8x32xf32>
    tpu.vector_store %arg10[%c0_15, %c0_16], %35 {strides = array<i32>} : memref<8x32xf32, #tpu.memory_space<vmem>>, vector<8x32xf32>,
    %c3_i32 = arith.constant 3 : i32
    %37 = arith.cmpi eq, %arg1, %c3_i32 : i32
    %38 = arith.extui %37 : i1 to i32
    %c0_i32_17 = arith.constant 0 : i32
    %39 = arith.cmpi ne, %38, %c0_i32_17 : i32
    scf.if %39 {
      %c0_18 = arith.constant 0 : index
      %c0_19 = arith.constant 0 : index
      %c0_20 = arith.constant 0 : index
      %40 = vector.load %arg2[%c0_18, %c0_19, %c0_20] : memref<1x8x32xf32, #tpu.memory_space<vmem>>, vector<1x8x32xf32>
      %41 = vector.shape_cast %40 : vector<1x8x32xf32> to vector<8x32xf32>
      %c0_21 = arith.constant 0 : index
      %c0_22 = arith.constant 0 : index
      %42 = vector.load %arg10[%c0_21, %c0_22] : memref<8x32xf32, #tpu.memory_space<vmem>>, vector<8x32xf32>
      %43 = arith.addf %41, %42 : vector<8x32xf32>
      %c0_23 = arith.constant 0 : index
      %c0_24 = arith.constant 0 : index
      %44 = vector.load %arg7[%c0_23, %c0_24] : memref<1x32xf32, #tpu.memory_space<vmem>>, vector<1x32xf32>
      %45 = vector.broadcast %44 : vector<1x32xf32> to vector<8x32xf32>
      %46 = arith.addf %43, %45 : vector<8x32xf32>
      %c0_25 = arith.constant 0 : index
      %c0_26 = arith.constant 0 : index
      %c0_27 = arith.constant 0 : index
      %47 = vector.load %arg8[%c0_25, %c0_26, %c0_27] : memref<1x8x32xf32, #tpu.memory_space<vmem>>, vector<1x8x32xf32>
      %48 = vector.shape_cast %47 : vector<1x8x32xf32> to vector<8x32xf32>
      %49 = vector.shape_cast %46 : vector<8x32xf32> to vector<1x8x32xf32>
      tpu.vector_store %arg8[%c0_25, %c0_26, %c0_27], %49 {strides = array<i32>} : memref<1x8x32xf32, #tpu.memory_space<vmem>>, vector<1x8x32xf32>,
    } else {
    }
    return
  }
  func.func @transform_0(%arg0: i32, %arg1: i32) -> (i32, i32, i32) {
    %c0_i32 = arith.constant 0 : i32
    %c0_i32_0 = arith.constant 0 : i32
    %c0_i32_1 = arith.constant 0 : i32
    return %arg0, %c0_i32, %c0_i32_0 : i32, i32, i32
  }
  func.func @transform_1(%arg0: i32, %arg1: i32) -> (i32, i32) {
    %c0_i32 = arith.constant 0 : i32
    %c0_i32_0 = arith.constant 0 : i32
    %c0_i32_1 = arith.constant 0 : i32
    return %c0_i32, %c0_i32_0 : i32, i32
  }
  func.func @transform_2(%arg0: i32, %arg1: i32) -> (i32, i32) {
    %c0_i32 = arith.constant 0 : i32
    %c0_i32_0 = arith.constant 0 : i32
    %c0_i32_1 = arith.constant 0 : i32
    return %c0_i32, %c0_i32_0 : i32, i32
  }
  func.func @transform_3(%arg0: i32, %arg1: i32) -> (i32, i32, i32) {
    %c0_i32 = arith.constant 0 : i32
    %c0_i32_0 = arith.constant 0 : i32
    %c0_i32_1 = arith.constant 0 : i32
    return %arg1, %c0_i32, %c0_i32_0 : i32, i32, i32
  }
  func.func @transform_4(%arg0: i32, %arg1: i32) -> (i32, i32, i32) {
    %c0_i32 = arith.constant 0 : i32
    %c0_i32_0 = arith.constant 0 : i32
    %c0_i32_1 = arith.constant 0 : i32
    return %arg1, %c0_i32, %c0_i32_0 : i32, i32, i32
  }
  func.func @transform_5(%arg0: i32, %arg1: i32) -> (i32, i32) {
    %c0_i32 = arith.constant 0 : i32
    %c0_i32_0 = arith.constant 0 : i32
    %c0_i32_1 = arith.constant 0 : i32
    return %c0_i32, %c0_i32_0 : i32, i32
  }
  func.func @transform_6(%arg0: i32, %arg1: i32) -> (i32, i32, i32) {
    %c0_i32 = arith.constant 0 : i32
    %c0_i32_0 = arith.constant 0 : i32
    %c0_i32_1 = arith.constant 0 : i32
    return %arg0, %c0_i32, %c0_i32_0 : i32, i32, i32
  }
}

</mosaic_0001>

<bundles_post_ra>
// kernel: tpu_custom_call.1
= control target key start
LH: loop header
LB: loop body
LE: loop exit
PB: predicated region body
PF: predicated region fallthrough
CT: control target
= control target key end

     0   :  { %11 = vsyncpa [#allocation5], 0  ;;  %s1191_s0 = inlined_call_operand.vmem [shape: f32[2,8,32], index: 0, kind: input, shape index: {}]   ;;  %s1192_s1 = inlined_call_operand.vmem [shape: f32[1,32], index: 1, kind: input, shape index: {}]   ;;  %s1193_s2 = inlined_call_operand.vmem [shape: f32[1,32], index: 2, kind: input, shape index: {}]   ;;  %s1194_s3 = inlined_call_operand.vmem [shape: bf16[4,32,384], index: 3, kind: input, shape index: {}]   ;;  %s1195_s4 = inlined_call_operand.vmem [shape: bf16[4,128,32], index: 4, kind: input, shape index: {}]   ;;  %s1196_s5 = inlined_call_operand.vmem [shape: f32[1,32], index: 5, kind: input, shape index: {}]   ;;  %s1197_s6 = inlined_call_operand.hbm [shape: f32[2,8,32], index: 6, kind: output, shape index: {}]  }
   0x1   :  { %13 = vsyncpa [#allocation5 + $0x1], 0  ;;  %s1006_s21 = smov 0   ;;  %s1008_s22 = smov 0  }
   0x2   :  { %s1010_s23 = smov 0   ;;  %s1012_s24 = smov 0  }
   0x3   :  { %s1014_s25 = smov 0   ;;  %s1016_s26 = smov 0  }
   0x4   :  { %s1018_s27 = smov 0   ;;  %s1020_s28 = smov 0  }
   0x5 LB: > { %1202 = sst [smem:[#allocation7_spill]] %s958_s26  ;;  %s694_s29 = sadd.s32 4294967295, %s966_s28   ;;  %s966_s28 = sphi %s1020_s28, %s19_s28   ;;  %s962_s27 = sphi %s1018_s27, %s1214_s27   ;;  %s958_s26 = sphi %s1016_s26, %s1213_s26   ;;  %s954_s25 = sphi %s1014_s25, %s1212_s25   ;;  %s950_s24 = sphi %s1012_s24, %s1211_s24   ;;  %s946_s23 = sphi %s1010_s23, %s1217_s23   ;;  %s942_s22 = sphi %s1008_s22, %s1216_s22   ;;  %s938_s21 = sphi %s1006_s21, %s1215_s21  }
   0x6   : > { %1203 = sst [smem:[#allocation8_spill]] %s962_s27  ;;  %s695_s30 = sadd.s32 4294967294, %s966_s28  }
   0x7   : > { %s28_s7 = sadd.s32 1, %s958_s26  ;;  %s31_s8 = sadd.s32 1, %s962_s27 }
   0x8   : > { %p29_p0 = scmp.ge.s32.totalorder %s28_s7, 4  ;;  %p189_p1 = scmp.ne.s32.totalorder %s946_s23, %s942_s22 }
   0x9   : > { %p190_p2 = scmp.eq.s32.totalorder %s694_s29, 7  ;;  %p195_p4 = scmp.ne.s32.totalorder %s942_s22, %s938_s21 }
   0xa   : > { %s1219_s7 = smov (%p29_p0, %s28_s7), 0  ;;  %s1221_s8 = smov (!%p29_p0, %s31_s8), %s962_s27 }
   0xb   : > { %1204 = sst [smem:[#allocation9_spill]] %s1219_s7  ;;  %p1055_p3 = por %p190_p2, %p189_p1 }
   0xc   : > { %p33_p5 = scmp.ge.s32.totalorder %s1221_s8, 2  ;;  %p196_p6 = scmp.eq.s32.totalorder %s695_s30, 7 }
   0xd   : > { %p698_p7 = scmp.ge.s32.totalorder %s966_s28, 1  ;;  %p246_p8 = scmp.lt.s32.totalorder %s966_s28, 9 }
   0xe   : > { %s1223_s8 = smov (%p33_p5, %s1221_s8), 0  ;;  %p1065_p9 = por %p196_p6, %p195_p4 }
   0xf   : > { %1206 = sst [smem:[#allocation10_spill]] %s1223_s8  ;;  %p247_p10 = pnand %p698_p7, %p246_p8 }
  0x10   : > { %s176_s11 = ssub.s32 %s962_s27, %s1223_s8  ;;  %s179_s12 = sadd.s32 1, %s946_s23 }
  0x11   : > { %p177_p11 = scmp.eq.s32.totalorder %s176_s11, 0  ;;  %250 = sbr.rel (%p247_p10) target bundleno = 1128 (0x468), region = 44 }
  0x12   : > { %s1200_s14 = sand.u32 (!%p247_p10), 1, %s942_s22   ;;  %p285_p12 = scmp.lt.s32.totalorder (!%p247_p10), %s954_s25, 1 }
  0x13   : > { %s1073_s13 = scalar_select %p177_p11, %s946_s23, %s179_s12  }
  0x14   : > { %s1079_s15 = sshll.u32 (!%p247_p10), %s1200_s14, 3  ;;  %p289_p13 = scmp.lt.s32.totalorder (!%p247_p10), %s950_s24, 3 }
  0x15   : > { %1208 = sst [smem:[#allocation11_spill]] %s1073_s13  ;;  %s284_s13 = scalar_lea.vmem (!%p247_p10), [#allocation4], %s1079_s15 }
  0x16   : > { %s286_s16 = scalar_select %p285_p12, %s954_s25, 1 }
  0x17   : > { %s290_s17 = scalar_select %p289_p13, %s950_s24, 3 }
  0x18   : > { %s700_s18 = sshll.u32 %s286_s16, 3  ;;  %p704_p0 = scmp.ne.s32.totalorder %s950_s24, 0 }
  0x19   : > { %s1087_s29 = scalar_lea.vmem %s1191_s0, %s700_s18  ;;  %s785_s30 = smul.u32 48, %s290_s17 }
  0x1a   : > { %s770_s11 = sshll.u32 %s290_s17, 6  ;;  %303 = sbr.rel (%p704_p0) target bundleno = 303 (0x12f), region = 48 }
  0x1b   : > { %s1092_s7 = scalar_lea.vmem %s1194_s3, %s785_s30  ;;  %s1097_s26 = scalar_lea.vmem %s1195_s4, %s770_s11 }
  0x1f   : > { %v304_v0 = vld [vmem:[%s1087_s29] sm:$0xff]  ;;  %vm307_vm0 = vcmask 261120   ;;  %v968_v2 = vmov 0.0   ;;  %v969_v3 = vmov 32.0   ;;  %vm346_vm5 = vcmask 257024  }
  0x20   : > { %v308_v1 = vsel %vm307_vm0, %v304_v0, 0.0  ;;  %348 = vst.msk [vmem:[#allocation3] sm:$0xff] %vm307_vm0, %v968_v2  ;;  %862 = vrcp.f32 %v969_v3  ;;  %v860_v24 = vld [vmem:[%s1192_s1] ss:$0 sm:$0xff] }
  0x21   : > { %309 = vadd.xlane.f32.xlu0 %v308_v1  ;;  %v861_v26 = vld [vmem:[%s1193_s2] ss:$0 sm:$0xff] }
  0x26   : > { %v863_v4 = vpop.eup %862 }
  0x27   : > { %v312_v5 = vmul.f32 32.0, %v863_v4  ;;  %vm316_vm1 = vweird.f32 %v863_v4 }
  0x29   : > { %v313_v6 = vsub.f32 1.0, %v312_v5 }
  0x2b   : > { %v314_v7 = vmul.f32 %v863_v4, %v313_v6 }
  0x2d   : > { %v315_v8 = vadd.f32 %v863_v4, %v314_v7 }
  0x2f   : > { %v317_v9 = vsel %vm316_vm1, %v863_v4, %v315_v8 }
  0x94   : > { %v310_v10 = vpop.xlane.xlu0 %309 }
  0x95   : > { %v318_v11 = vmul.f32 %v317_v9, %v310_v10 }
  0x97   : > { %v319_v12 = vsub.f32 %v304_v0, %v318_v11 }
  0x99   : > { %v320_v13 = vmul.f32 %v319_v12, %v319_v12 }
  0x9b   : > { %v321_v14 = vsel %vm307_vm0, %v320_v13, 0.0 }
  0x9c   : > { %322 = vadd.xlane.f32.xlu0 %v321_v14 }
 0x10f   : > { %v323_v15 = vpop.xlane.xlu0 %322 }
 0x110   : > { %v324_v16 = vmul.f32 %v323_v15, %v317_v9 }
 0x112   : > { %v325_v17 = vadd.f32 1e-05, %v324_v16 }
 0x114   : > { %864 = vrsqrt.f32 %v325_v17  ;;  %vm332_vm3 = vweird.f32 %v325_v17 }
 0x11a   : > { %v865_v18 = vpop.eup %864 }
 0x11b   : > { %v327_v19 = vmul.f32 %v865_v18, %v325_v17  ;;  %vm333_vm2 = vweird.f32 %v865_v18 }
 0x11c   : > { %vm334_vm4 = vmor %vm332_vm3, %vm333_vm2 }
 0x11d   : > { %v328_v20 = vmul.f32 %v865_v18, %v327_v19 }
 0x11f   : > { %v329_v21 = vmul.f32 0.5, %v328_v20 }
 0x121   : > { %v330_v22 = vsub.f32 1.5, %v329_v21 }
 0x123   : > { %v331_v23 = vmul.f32 %v865_v18, %v330_v22 }
 0x125   : > { %v335_v25 = vsel %vm334_vm4, %v865_v18, %v331_v23 }
 0x126   : > { %v336_v27 = vmul.f32 %v335_v25, %v319_v12 }
 0x128   : > { %v340_v28 = vmul.f32 %v860_v24, %v336_v27 }
 0x12a   : > { %v344_v29 = vadd.f32 %v861_v26, %v340_v28 }
 0x12c   : > { %v345_v30 = vpack.c.bf16 %v344_v29, %v344_v29 }
 0x12e   : > { %347 = vst.msk [vmem:[#allocation2] sm:$0xf] %vm346_vm5, %v345_v30 }
 0x12f PF: > { %v774_v31 = vld [vmem:[%s1092_s7 + $0x1c] sm:$0xf]  ;;  %v721_v32 = vld [vmem:[%s1092_s7 + $0x24] sm:$0xf0]  ;;  %v771_v33 = vld [vmem:[%s1092_s7 + $0x4] sm:$0xf]  ;;  %v433_v61 = vlaneseq }
 0x130   : > { %v724_v34 = vor.u32 %v774_v31, %v721_v32  ;;  %v709_v35 = vld [vmem:[%s1092_s7 + $0xc] sm:$0xf0]  ;;  %v719_v36 = vld [vmem:[%s1092_s7 + $0x18] sm:$0xf]  ;;  %v775_v37 = vld [vmem:[%s1092_s7 + $0x20] sm:$0xf0] }
 0x131   : > { %v720_v38 = vor.u32 %v775_v37, %v719_v36  ;;  %v707_v39 = vld [vmem:[%s1092_s7] sm:$0xf]  ;;  %v712_v40 = vor.u32 %v771_v33, %v709_v35  ;;  %v772_v41 = vld [vmem:[%s1092_s7 + $0x8] sm:$0xf0]  ;;  %vm390_vm6 = vcmask 261120   ;;  %vm452_vm7 = vcmask 64512  }
 0x132   : > { %413 = vmatpush.bf16.msra.mxu2 %v724_v34  ;;  %v708_v42 = vor.u32 %v772_v41, %v707_v39  ;;  %v727_v44 = vld [vmem:[%s1092_s7 + $0x20] sm:$0xf]  ;;  %v776_v45 = vld [vmem:[%s1092_s7 + $0x28] sm:$0xf0]  ;;  %v715_v46 = vld [vmem:[%s1092_s7 + $0x8] sm:$0xf] }
 0x133   : > { %400 = vmatpush.bf16.msra.mxu0 %v720_v38  ;;  %v728_v47 = vor.u32 %v776_v45, %v727_v44  ;;  %v773_v48 = vld [vmem:[%s1092_s7 + $0x10] sm:$0xf0]  ;;  %v434_v62 = vand.u32 127, %v433_v61  ;;  %vm466_vm9 = vcmask 1043456   ;;  %v970_v9 = vmov 8   ;;  %v784_v10 = vld [vmem:[%s1097_s26 + $0x38] sm:$0xff] }
 0x134   : > { %v716_v49 = vor.u32 %v773_v48, %v715_v46  ;;  %866 = vset.pattern.permute.xlu0 %v970_v9  ;;  %556 = vmatpush.bf16.msra.mxu1 %v784_v10  ;;  %v783_v11 = vld [vmem:[%s1097_s26 + $0x30] sm:$0xff]  ;;  %v782_v12 = vld [vmem:[%s1097_s26 + $0x28] sm:$0xff]  ;;  %v781_v13 = vld [vmem:[%s1097_s26 + $0x20] sm:$0xff]  ;;  %p765_p1 = scmp.ne.s32.totalorder %s950_s24, 3 }
 0x135   : > { %v349_v43 = vld [vmem:[#allocation2] sm:$0xf]  ;;  %vm435_vm8 = vcmp.eq.s32.totalorder %v434_v62, 8  ;;  %v780_v14 = vld [vmem:[%s1097_s26 + $0x18] sm:$0xff]  ;;  %v779_v15 = vld [vmem:[%s1097_s26 + $0x10] sm:$0xff] }
 0x136   : > { %414 = vmatpush.bf16.msra.mxu2 %v712_v40  ;;  %v778_v16 = vld [vmem:[%s1097_s26 + $0x8] sm:$0xff]  ;;  %v777_v20 = vld [vmem:[%s1097_s26] sm:$0xff] }
 0x137   : > { %401 = vmatpush.bf16.msra.mxu0 %v708_v42  ;;  %v490_v24 = vld [vmem:[#allocation3] sm:$0xff] }
 0x138   : > { %557 = vmatpush.bf16.msra.mxu1 %v783_v11 }
 0x139   : > { %730 = vmatmul.msk.bf16.vlgmr.msra.gmra.mxu2 %vm390_vm6, %v349_v43 }
 0x13a   : > { %729 = vmatmul.msk.bf16.vlgmr.msra.gmra.mxu0 %vm390_vm6, %v349_v43  ;;  %426 = vmatpush.bf16.msrb.mxu2 %v728_v47 }
 0x13c   : > { %558 = vmatpush.bf16.msra.mxu1 %v782_v12 }
 0x13e   : > { %427 = vmatpush.bf16.msrb.mxu2 %v716_v49 }
 0x140   : > { %559 = vmatpush.bf16.msra.mxu1 %v781_v13 }
 0x144   : > { %560 = vmatpush.bf16.msra.mxu1 %v780_v14 }
 0x148   : > { %561 = vmatpush.bf16.msra.mxu1 %v779_v15 }
 0x149   : > { %731 = vmatmul.msk.bf16.vlgmr.msrb.gmra.mxu2 %vm390_vm6, %v349_v43 }
 0x14c   : > { %562 = vmatpush.bf16.msra.mxu1 %v778_v16 }
 0x150   : > { %563 = vmatpush.bf16.msra.mxu1 %v777_v20 }
 0x1b7   : > { %v403_v50 = vpop.f32.mrf.mxu0 }
 0x1b8   : > { %v437_v54 = vpack.c.bf16 %v403_v50, %v403_v50 }
 0x1bc   : > { %v416_v51 = vpop.f32.mrf.mxu2 }
 0x1bd   : > { %v438_v52 = vpack.c.bf16 %v416_v51, %v416_v51 }
 0x1bf   : > { %446 = vmatpush.bf16.xpose.msra.mxu3 %v438_v52  ;;  %v405_v53 = vpop.f32.mrf.mxu0 }
 0x1c4   : > { %v418_v55 = vpop.f32.mrf.mxu2 }
 0x1c6   : > { %447 = vmatmul.bf16.vlgmr.msra.gmra.mxu3 %v437_v54 }
 0x1cc   : > { %v429_v56 = vpop.f32.mrf.mxu2 }
 0x1cd   : > { %v436_v63 = vsel %vm435_vm8, 1.0, %v429_v56 }
 0x1ce   : > { %v462_v0 = vpack.c.bf16 %v436_v63, %v436_v63 }
 0x1d0   : > { %v468_v1 = vsel %vm466_vm9, %v462_v0, 0 }
 0x1d1   : > { %477 = vmatpush.bf16.msrb.mxu0 %v468_v1 }
 0x1d4   : > { %v431_v57 = vpop.f32.mrf.mxu2 }
 0x249   : > { %v448_v58 = vpop.f32.mrf.mxu3 }
 0x24a   : > { %v453_v59 = vsel %vm452_vm7, %v448_v58, -inf }
 0x24b   : > { %454 = vmax.xlane.f32.xlu0 %v453_v59 }
 0x251   : > { %v450_v60 = vpop.f32.mrf.mxu3 }
 0x2be   : > { %v455_v2 = vpop.xlane.xlu0 %454 }
 0x2bf   : > { %v456_v3 = vsub.f32 %v448_v58, %v455_v2 }
 0x2c1   : > { %v457_v4 = vpack.c.bf16 %v456_v3, %v456_v3 }
 0x2c3   : > { %v458_v5 = vunpack.c.l.bf16 %v457_v4 }
 0x2c5   : > { %v459_v6 = vmul.f32 1.442695, %v458_v5 }
 0x2c7   : > { %867 = vpow2.f32 %v459_v6 }
 0x2cd   : > { %v868_v7 = vpop.eup %867 }
 0x2ce   : > { %v461_v8 = vpack.c.bf16 %v868_v7, %v868_v7 }
 0x2d0   : > { %732 = vmatmul.msk.bf16.vlgmr.msrb.gmra.mxu0 %vm452_vm7, %v461_v8 }
 0x34d   : > { %v479_v17 = vpop.f32.mrf.mxu0 }
 0x34e   : > { %869 = vrcp.f32 %v479_v17 }
 0x354   : > { %v870_v18 = vpop.eup %869 }
 0x355   : > { %486 = vperm.xlu0 %866, %v870_v18   ;;  %v481_v19 = vpop.f32.mrf.mxu0 }
 0x3c7   : > { %v487_v21 = vpop.permute.xlu0 %486 }
 0x3c8   : > { %v489_v22 = vmul.f32 %v487_v21, %v479_v17 }
 0x3ca   : > { %v491_v23 = vpack.c.bf16 %v489_v22, %v489_v22 }
 0x3cc   : > { %564 = vmatmul.bf16.vlgmr.msra.gmra.mxu1 %v491_v23 }
 0x449   : > { %v565_v25 = vpop.f32.mrf.mxu1 }
 0x44a   : > { %v569_v26 = vadd.f32 %v565_v25, %v490_v24 }
 0x44c   : > { %570 = vst.msk [vmem:[#allocation3] sm:$0xff] %vm390_vm6, %v569_v26 }
 0x44d   : > { %574 = sbr.rel (%p765_p1) target bundleno = 1113 (0x459), region = 52 }
 0x451   : > { %v567_v27 = vpop.f32.mrf.mxu1 }
 0x452   : > { %v575_v28 = vld [vmem:[%s1087_s29] sm:$0xff] }
 0x453   : > { %v576_v29 = vld [vmem:[#allocation3] sm:$0xff]  ;;  %v871_v31 = vld [vmem:[%s1196_s5] ss:$0 sm:$0xff] }
 0x454   : > { %v577_v30 = vadd.f32 %v576_v29, %v575_v28 }
 0x456   : > { %v582_v32 = vadd.f32 %v871_v31, %v577_v30 }
 0x458   : > { %583 = vst.msk [vmem:[%s284_s13] sm:$0xff] %vm390_vm6, %v582_v32 }
 0x459 PF: > { %s767_s24 = sshll.u32 %s954_s25, 3  ;;  %s597_s20 = sshll.u32 %s284_s13, 4  ;;  %s598_s20 = int_to_ptr.vmem [resolvable:$true] %s597_s20 }
 0x45a   : > { %s595_s19 = scalar_lea.hbm %s1197_s6, %s767_s24  ;;  %s1209_s30 = sand.u32 1, %s942_s22  }
 0x45b   : > { %s599_s29 = sshll.u32 %s595_s19, 4  ;;  %s585_s11 = scalar_lea.sflag [#allocation5], %s1209_s30  ;;  %s600_s29 = int_to_ptr.hbm [resolvable:$true] %s599_s29 }
 0x45c   : > { %s886_s12 = sshra.s32 %s600_s29, 4  ;;  %s892_s14 = scalar_lea.hbm %s1197_s6, 16  ;;  %s887_s12 = int_to_ptr.hbm [resolvable:$true] %s886_s12 }
 0x45d   : > { %s888_s27 = scalar_lea.hbm %s887_s12, 8  ;;  %p893_p6 = scmp.lt.s32.totalorder %s887_s12, %s1197_s6 }
 0x45e   : > { %p889_p2 = scmp.ne.s32.totalorder %s887_s12, %s888_s27  ;;  %p894_p7 = scmp.lt.s32.totalorder %s892_s14, %s888_s27 }
 0x460   : > { %p890_p4 = pnand %p889_p2, %p1055_p3  ;;  %p895_p8 = por %p894_p7, %p893_p6 }
 0x462   : > { %p891_p5 = pneg %p890_p4 }
 0x464   : > { %p896_p10 = pnand %p895_p8, %p891_p5 }
 0x466   : > { %899 = shalt.err (!%p896_p10)
}
 0x467   : > { %786 = dma.vmem_to_hbm [thread:$0]  (%p1055_p3), %s598_s20, 128, %s600_s29, %s585_s11  }
 0x468 PF: > { %p792_p11 = scmp.ge.s32.totalorder %s966_s28, 2  ;;  %s611_s13 = sand.u32 1, %s938_s21  }
 0x469   : > { %s612_s15 = scalar_lea.sflag [#allocation5], %s611_s13 }
 0x46a   : > { %p789_p12 = pnand %p792_p11, %p1065_p9 }
 0x46c   : > { %p790_p13 = pneg %p789_p12 }
 0x46e   : > { %933 = dma.done.wait (%p790_p13), %s612_s15, 128  }
 0x46f   : > { %935 = vsyncadd (%p790_p13), %s612_s15, 4294967168  ;;  %s19_s28 = sadd.s32 1, %s966_s28   ;;  %s1210_s7 = sld [smem:[#allocation11_spill]] }
 0x470   : > { %p16_p0 = scmp.ge.s32.totalorder %s19_s28, 10   ;;  %s1211_s24 = sld [smem:[#allocation7_spill]] }
 0x471   : > { %s1212_s25 = sld [smem:[#allocation8_spill]]  ;;  %s1215_s21 = smov %s942_s22 }
 0x472   : > { %s1213_s26 = sld [smem:[#allocation9_spill]]  ;;  %s1216_s22 = smov %s946_s23 }
 0x473   : > { %s1214_s27 = sld [smem:[#allocation10_spill]]  ;;  %18 = sbr.rel (!%p16_p0) target bundleno = 5 (0x5), region = 93 }
 0x475   : > { %s1217_s23 = smov %s1210_s7 }
 0x478   :  { %618 = vsyncpa [#allocation5], 1 }
 0x479   :  { %620 = vsyncpa [#allocation5 + $0x1], 1 }

// kernel: tpu_custom_call.1
= control target key start
LH: loop header
LB: loop body
LE: loop exit
PB: predicated region body
PF: predicated region fallthrough
CT: control target
= control target key end

     0   :  { %11 = vsyncpa [#allocation5], 0  ;;  %s1187_s0 = inlined_call_operand.vmem [shape: f32[2,8,32], index: 0, kind: input, shape index: {}]   ;;  %s1188_s1 = inlined_call_operand.vmem [shape: f32[1,32], index: 1, kind: input, shape index: {}]   ;;  %s1189_s2 = inlined_call_operand.vmem [shape: f32[1,32], index: 2, kind: input, shape index: {}]   ;;  %s1190_s3 = inlined_call_operand.vmem [shape: bf16[4,32,384], index: 3, kind: input, shape index: {}]   ;;  %s1191_s4 = inlined_call_operand.vmem [shape: bf16[4,128,32], index: 4, kind: input, shape index: {}]   ;;  %s1192_s5 = inlined_call_operand.vmem [shape: f32[1,32], index: 5, kind: input, shape index: {}]   ;;  %s1193_s6 = inlined_call_operand.hbm [shape: f32[2,8,32], index: 6, kind: output, shape index: {}]  }
   0x1   :  { %13 = vsyncpa [#allocation5 + $0x1], 0  ;;  %s1004_s21 = smov 0   ;;  %s1006_s22 = smov 0  }
   0x2   :  { %s1008_s23 = smov 0   ;;  %s1010_s24 = smov 0  }
   0x3   :  { %s1012_s25 = smov 0   ;;  %s1014_s26 = smov 0  }
   0x4   :  { %s1016_s27 = smov 0   ;;  %s1018_s28 = smov 0  }
   0x5 LB: > { %1198 = sst [smem:[#allocation7_spill]] %s956_s26  ;;  %s692_s29 = sadd.s32 4294967295, %s964_s28   ;;  %s964_s28 = sphi %s1018_s28, %s19_s28   ;;  %s960_s27 = sphi %s1016_s27, %s1210_s27   ;;  %s956_s26 = sphi %s1014_s26, %s1209_s26   ;;  %s952_s25 = sphi %s1012_s25, %s1208_s25   ;;  %s948_s24 = sphi %s1010_s24, %s1207_s24   ;;  %s944_s23 = sphi %s1008_s23, %s1213_s23   ;;  %s940_s22 = sphi %s1006_s22, %s1212_s22   ;;  %s936_s21 = sphi %s1004_s21, %s1211_s21  }
   0x6   : > { %1199 = sst [smem:[#allocation8_spill]] %s960_s27  ;;  %s693_s30 = sadd.s32 4294967294, %s964_s28  }
   0x7   : > { %s28_s7 = sadd.s32 1, %s956_s26  ;;  %s31_s8 = sadd.s32 1, %s960_s27 }
   0x8   : > { %p29_p0 = scmp.ge.s32.totalorder %s28_s7, 4  ;;  %p189_p1 = scmp.ne.s32.totalorder %s944_s23, %s940_s22 }
   0x9   : > { %p190_p2 = scmp.eq.s32.totalorder %s692_s29, 7  ;;  %p195_p4 = scmp.ne.s32.totalorder %s940_s22, %s936_s21 }
   0xa   : > { %s1215_s7 = smov (%p29_p0, %s28_s7), 0  ;;  %s1217_s8 = smov (!%p29_p0, %s31_s8), %s960_s27 }
   0xb   : > { %1200 = sst [smem:[#allocation9_spill]] %s1215_s7  ;;  %p1053_p3 = por %p190_p2, %p189_p1 }
   0xc   : > { %p33_p5 = scmp.ge.s32.totalorder %s1217_s8, 2  ;;  %p196_p6 = scmp.eq.s32.totalorder %s693_s30, 7 }
   0xd   : > { %p696_p7 = scmp.ge.s32.totalorder %s964_s28, 1  ;;  %p246_p8 = scmp.lt.s32.totalorder %s964_s28, 9 }
   0xe   : > { %s1219_s8 = smov (%p33_p5, %s1217_s8), 0  ;;  %p1063_p9 = por %p196_p6, %p195_p4 }
   0xf   : > { %1202 = sst [smem:[#allocation10_spill]] %s1219_s8  ;;  %p247_p10 = pnand %p696_p7, %p246_p8 }
  0x10   : > { %s176_s11 = ssub.s32 %s960_s27, %s1219_s8  ;;  %s179_s12 = sadd.s32 1, %s944_s23 }
  0x11   : > { %p177_p11 = scmp.eq.s32.totalorder %s176_s11, 0  ;;  %250 = sbr.rel (%p247_p10) target bundleno = 1124 (0x464), region = 44 }
  0x12   : > { %s1196_s14 = sand.u32 (!%p247_p10), 1, %s940_s22   ;;  %p285_p12 = scmp.lt.s32.totalorder (!%p247_p10), %s952_s25, 1 }
  0x13   : > { %s1071_s13 = scalar_select %p177_p11, %s944_s23, %s179_s12  }
  0x14   : > { %s1077_s15 = sshll.u32 (!%p247_p10), %s1196_s14, 3  ;;  %p289_p13 = scmp.lt.s32.totalorder (!%p247_p10), %s948_s24, 3 }
  0x15   : > { %1204 = sst [smem:[#allocation11_spill]] %s1071_s13  ;;  %s284_s13 = scalar_lea.vmem (!%p247_p10), [#allocation4], %s1077_s15 }
  0x16   : > { %s286_s16 = scalar_select %p285_p12, %s952_s25, 1 }
  0x17   : > { %s290_s17 = scalar_select %p289_p13, %s948_s24, 3 }
  0x18   : > { %s698_s18 = sshll.u32 %s286_s16, 3  ;;  %p702_p0 = scmp.ne.s32.totalorder %s948_s24, 0 }
  0x19   : > { %s1085_s29 = scalar_lea.vmem %s1187_s0, %s698_s18  ;;  %s783_s30 = smul.u32 48, %s290_s17 }
  0x1a   : > { %s768_s11 = sshll.u32 %s290_s17, 6  ;;  %303 = sbr.rel (%p702_p0) target bundleno = 303 (0x12f), region = 48 }
  0x1b   : > { %s1090_s7 = scalar_lea.vmem %s1190_s3, %s783_s30  ;;  %s1095_s26 = scalar_lea.vmem %s1191_s4, %s768_s11 }
  0x1f   : > { %v304_v0 = vld [vmem:[%s1085_s29] sm:$0xff]  ;;  %vm307_vm0 = vcmask 261120   ;;  %v966_v2 = vmov 0.0   ;;  %v967_v3 = vmov 32.0   ;;  %vm346_vm5 = vcmask 257024  }
  0x20   : > { %v308_v1 = vsel %vm307_vm0, %v304_v0, 0.0  ;;  %348 = vst.msk [vmem:[#allocation3] sm:$0xff] %vm307_vm0, %v966_v2  ;;  %860 = vrcp.f32 %v967_v3  ;;  %v858_v24 = vld [vmem:[%s1188_s1] ss:$0 sm:$0xff] }
  0x21   : > { %309 = vadd.xlane.f32.xlu0 %v308_v1  ;;  %v859_v26 = vld [vmem:[%s1189_s2] ss:$0 sm:$0xff] }
  0x26   : > { %v861_v4 = vpop.eup %860 }
  0x27   : > { %v312_v5 = vmul.f32 32.0, %v861_v4  ;;  %vm316_vm1 = vweird.f32 %v861_v4 }
  0x29   : > { %v313_v6 = vsub.f32 1.0, %v312_v5 }
  0x2b   : > { %v314_v7 = vmul.f32 %v861_v4, %v313_v6 }
  0x2d   : > { %v315_v8 = vadd.f32 %v861_v4, %v314_v7 }
  0x2f   : > { %v317_v9 = vsel %vm316_vm1, %v861_v4, %v315_v8 }
  0x94   : > { %v310_v10 = vpop.xlane.xlu0 %309 }
  0x95   : > { %v318_v11 = vmul.f32 %v317_v9, %v310_v10 }
  0x97   : > { %v319_v12 = vsub.f32 %v304_v0, %v318_v11 }
  0x99   : > { %v320_v13 = vmul.f32 %v319_v12, %v319_v12 }
  0x9b   : > { %v321_v14 = vsel %vm307_vm0, %v320_v13, 0.0 }
  0x9c   : > { %322 = vadd.xlane.f32.xlu0 %v321_v14 }
 0x10f   : > { %v323_v15 = vpop.xlane.xlu0 %322 }
 0x110   : > { %v324_v16 = vmul.f32 %v323_v15, %v317_v9 }
 0x112   : > { %v325_v17 = vadd.f32 1e-05, %v324_v16 }
 0x114   : > { %862 = vrsqrt.f32 %v325_v17  ;;  %vm332_vm3 = vweird.f32 %v325_v17 }
 0x11a   : > { %v863_v18 = vpop.eup %862 }
 0x11b   : > { %v327_v19 = vmul.f32 %v863_v18, %v325_v17  ;;  %vm333_vm2 = vweird.f32 %v863_v18 }
 0x11c   : > { %vm334_vm4 = vmor %vm332_vm3, %vm333_vm2 }
 0x11d   : > { %v328_v20 = vmul.f32 %v863_v18, %v327_v19 }
 0x11f   : > { %v329_v21 = vmul.f32 0.5, %v328_v20 }
 0x121   : > { %v330_v22 = vsub.f32 1.5, %v329_v21 }
 0x123   : > { %v331_v23 = vmul.f32 %v863_v18, %v330_v22 }
 0x125   : > { %v335_v25 = vsel %vm334_vm4, %v863_v18, %v331_v23 }
 0x126   : > { %v336_v27 = vmul.f32 %v335_v25, %v319_v12 }
 0x128   : > { %v340_v28 = vmul.f32 %v858_v24, %v336_v27 }
 0x12a   : > { %v344_v29 = vadd.f32 %v859_v26, %v340_v28 }
 0x12c   : > { %v345_v30 = vpack.c.bf16 %v344_v29, %v344_v29 }
 0x12e   : > { %347 = vst.msk [vmem:[#allocation2] sm:$0xf] %vm346_vm5, %v345_v30 }
 0x12f PF: > { %v772_v31 = vld [vmem:[%s1090_s7 + $0x1c] sm:$0xf]  ;;  %v719_v32 = vld [vmem:[%s1090_s7 + $0x24] sm:$0xf0]  ;;  %v769_v33 = vld [vmem:[%s1090_s7 + $0x4] sm:$0xf]  ;;  %v433_v56 = vlaneseq }
 0x130   : > { %v722_v34 = vor.u32 %v772_v31, %v719_v32  ;;  %v707_v35 = vld [vmem:[%s1090_s7 + $0xc] sm:$0xf0]  ;;  %v717_v36 = vld [vmem:[%s1090_s7 + $0x18] sm:$0xf]  ;;  %v773_v37 = vld [vmem:[%s1090_s7 + $0x20] sm:$0xf0] }
 0x131   : > { %v718_v38 = vor.u32 %v773_v37, %v717_v36  ;;  %v705_v39 = vld [vmem:[%s1090_s7] sm:$0xf]  ;;  %v710_v40 = vor.u32 %v769_v33, %v707_v35  ;;  %v770_v41 = vld [vmem:[%s1090_s7 + $0x8] sm:$0xf0]  ;;  %vm390_vm6 = vcmask 261120   ;;  %v434_v58 = vand.u32 127, %v433_v56 }
 0x132   : > { %413 = vmatpush.bf16.msra.mxu2 %v722_v34  ;;  %v706_v42 = vor.u32 %v770_v41, %v705_v39  ;;  %v725_v44 = vld [vmem:[%s1090_s7 + $0x20] sm:$0xf]  ;;  %v774_v45 = vld [vmem:[%s1090_s7 + $0x28] sm:$0xf0]  ;;  %v713_v46 = vld [vmem:[%s1090_s7 + $0x8] sm:$0xf] }
 0x133   : > { %400 = vmatpush.bf16.msra.mxu0 %v718_v38  ;;  %v726_v47 = vor.u32 %v774_v45, %v725_v44  ;;  %v771_v48 = vld [vmem:[%s1090_s7 + $0x10] sm:$0xf0]  ;;  %vm435_vm7 = vcmp.eq.s32.totalorder %v434_v58, 8  ;;  %vm464_vm8 = vcmask 1043456   ;;  %vm452_vm9 = vcmask 64512   ;;  %v782_v8 = vld [vmem:[%s1095_s26 + $0x38] sm:$0xff] }
 0x134   : > { %v714_v49 = vor.u32 %v771_v48, %v713_v46  ;;  %v968_v7 = vmov 8   ;;  %554 = vmatpush.bf16.msra.mxu1 %v782_v8  ;;  %v781_v9 = vld [vmem:[%s1095_s26 + $0x30] sm:$0xff]  ;;  %v780_v10 = vld [vmem:[%s1095_s26 + $0x28] sm:$0xff]  ;;  %v779_v11 = vld [vmem:[%s1095_s26 + $0x20] sm:$0xff]  ;;  %p763_p1 = scmp.ne.s32.totalorder %s948_s24, 3 }
 0x135   : > { %v349_v43 = vld [vmem:[#allocation2] sm:$0xf]  ;;  %864 = vset.pattern.permute.xlu0 %v968_v7  ;;  %v778_v12 = vld [vmem:[%s1095_s26 + $0x18] sm:$0xff]  ;;  %v777_v13 = vld [vmem:[%s1095_s26 + $0x10] sm:$0xff] }
 0x136   : > { %414 = vmatpush.bf16.msra.mxu2 %v710_v40  ;;  %v776_v14 = vld [vmem:[%s1095_s26 + $0x8] sm:$0xff]  ;;  %v775_v18 = vld [vmem:[%s1095_s26] sm:$0xff] }
 0x137   : > { %401 = vmatpush.bf16.msra.mxu0 %v706_v42  ;;  %v488_v22 = vld [vmem:[#allocation3] sm:$0xff] }
 0x138   : > { %555 = vmatpush.bf16.msra.mxu1 %v781_v9 }
 0x139   : > { %728 = vmatmul.msk.bf16.vlgmr.msra.gmra.mxu2 %vm390_vm6, %v349_v43 }
 0x13a   : > { %727 = vmatmul.msk.bf16.vlgmr.msra.gmra.mxu0 %vm390_vm6, %v349_v43  ;;  %426 = vmatpush.bf16.msrb.mxu2 %v726_v47 }
 0x13c   : > { %556 = vmatpush.bf16.msra.mxu1 %v780_v10 }
 0x13e   : > { %427 = vmatpush.bf16.msrb.mxu2 %v714_v49 }
 0x140   : > { %557 = vmatpush.bf16.msra.mxu1 %v779_v11 }
 0x144   : > { %558 = vmatpush.bf16.msra.mxu1 %v778_v12 }
 0x148   : > { %559 = vmatpush.bf16.msra.mxu1 %v777_v13 }
 0x149   : > { %729 = vmatmul.msk.bf16.vlgmr.msrb.gmra.mxu2 %vm390_vm6, %v349_v43 }
 0x14c   : > { %560 = vmatpush.bf16.msra.mxu1 %v776_v14 }
 0x150   : > { %561 = vmatpush.bf16.msra.mxu1 %v775_v18 }
 0x1b7   : > { %v403_v50 = vpop.f32.mrf.mxu0 }
 0x1b8   : > { %v437_v54 = vpack.c.bf16 %v403_v50, %v403_v50 }
 0x1bc   : > { %v416_v51 = vpop.f32.mrf.mxu2 }
 0x1bd   : > { %v438_v52 = vpack.c.bf16 %v416_v51, %v416_v51 }
 0x1bf   : > { %446 = vmatpush.bf16.xpose.msra.mxu3 %v438_v52  ;;  %v405_v53 = vpop.f32.mrf.mxu0 }
 0x1c4   : > { %v418_v55 = vpop.f32.mrf.mxu2 }
 0x1c6   : > { %447 = vmatmul.bf16.vlgmr.msra.gmra.mxu3 %v437_v54 }
 0x1cc   : > { %v429_v57 = vpop.f32.mrf.mxu2 }
 0x1cd   : > { %v436_v59 = vsel %vm435_vm7, 1.0, %v429_v57 }
 0x1ce   : > { %v460_v60 = vpack.c.bf16 %v436_v59, %v436_v59 }
 0x1d0   : > { %v466_v61 = vsel %vm464_vm8, %v460_v60, 0 }
 0x1d1   : > { %475 = vmatpush.bf16.msrb.mxu0 %v466_v61 }
 0x1d4   : > { %v431_v62 = vpop.f32.mrf.mxu2 }
 0x249   : > { %v448_v63 = vpop.f32.mrf.mxu3 }
 0x24a   : > { %v453_v0 = vsel %vm452_vm9, %v448_v63, -inf }
 0x24b   : > { %454 = vmax.xlane.f32.xlu0 %v453_v0 }
 0x251   : > { %v450_v1 = vpop.f32.mrf.mxu3 }
 0x2be   : > { %v455_v2 = vpop.xlane.xlu0 %454 }
 0x2bf   : > { %v456_v3 = vsub.f32 %v448_v63, %v455_v2 }
 0x2c1   : > { %v457_v4 = vmul.f32 1.442695, %v456_v3 }
 0x2c3   : > { %865 = vpow2.f32 %v457_v4 }
 0x2c9   : > { %v866_v5 = vpop.eup %865 }
 0x2ca   : > { %v459_v6 = vpack.c.bf16 %v866_v5, %v866_v5 }
 0x2cc   : > { %730 = vmatmul.msk.bf16.vlgmr.msrb.gmra.mxu0 %vm452_vm9, %v459_v6 }
 0x349   : > { %v477_v15 = vpop.f32.mrf.mxu0 }
 0x34a   : > { %867 = vrcp.f32 %v477_v15 }
 0x350   : > { %v868_v16 = vpop.eup %867 }
 0x351   : > { %484 = vperm.xlu0 %864, %v868_v16   ;;  %v479_v17 = vpop.f32.mrf.mxu0 }
 0x3c3   : > { %v485_v19 = vpop.permute.xlu0 %484 }
 0x3c4   : > { %v487_v20 = vmul.f32 %v485_v19, %v477_v15 }
 0x3c6   : > { %v489_v21 = vpack.c.bf16 %v487_v20, %v487_v20 }
 0x3c8   : > { %562 = vmatmul.bf16.vlgmr.msra.gmra.mxu1 %v489_v21 }
 0x445   : > { %v563_v23 = vpop.f32.mrf.mxu1 }
 0x446   : > { %v567_v24 = vadd.f32 %v563_v23, %v488_v22 }
 0x448   : > { %568 = vst.msk [vmem:[#allocation3] sm:$0xff] %vm390_vm6, %v567_v24 }
 0x449   : > { %572 = sbr.rel (%p763_p1) target bundleno = 1109 (0x455), region = 52 }
 0x44d   : > { %v565_v25 = vpop.f32.mrf.mxu1 }
 0x44e   : > { %v573_v26 = vld [vmem:[%s1085_s29] sm:$0xff] }
 0x44f   : > { %v574_v27 = vld [vmem:[#allocation3] sm:$0xff]  ;;  %v869_v29 = vld [vmem:[%s1192_s5] ss:$0 sm:$0xff] }
 0x450   : > { %v575_v28 = vadd.f32 %v574_v27, %v573_v26 }
 0x452   : > { %v580_v30 = vadd.f32 %v869_v29, %v575_v28 }
 0x454   : > { %581 = vst.msk [vmem:[%s284_s13] sm:$0xff] %vm390_vm6, %v580_v30 }
 0x455 PF: > { %s765_s24 = sshll.u32 %s952_s25, 3  ;;  %s595_s20 = sshll.u32 %s284_s13, 4  ;;  %s596_s20 = int_to_ptr.vmem [resolvable:$true] %s595_s20 }
 0x456   : > { %s593_s19 = scalar_lea.hbm %s1193_s6, %s765_s24  ;;  %s1205_s30 = sand.u32 1, %s940_s22  }
 0x457   : > { %s597_s29 = sshll.u32 %s593_s19, 4  ;;  %s583_s11 = scalar_lea.sflag [#allocation5], %s1205_s30  ;;  %s598_s29 = int_to_ptr.hbm [resolvable:$true] %s597_s29 }
 0x458   : > { %s884_s12 = sshra.s32 %s598_s29, 4  ;;  %s890_s14 = scalar_lea.hbm %s1193_s6, 16  ;;  %s885_s12 = int_to_ptr.hbm [resolvable:$true] %s884_s12 }
 0x459   : > { %s886_s27 = scalar_lea.hbm %s885_s12, 8  ;;  %p891_p6 = scmp.lt.s32.totalorder %s885_s12, %s1193_s6 }
 0x45a   : > { %p887_p2 = scmp.ne.s32.totalorder %s885_s12, %s886_s27  ;;  %p892_p7 = scmp.lt.s32.totalorder %s890_s14, %s886_s27 }
 0x45c   : > { %p888_p4 = pnand %p887_p2, %p1053_p3  ;;  %p893_p8 = por %p892_p7, %p891_p6 }
 0x45e   : > { %p889_p5 = pneg %p888_p4 }
 0x460   : > { %p894_p10 = pnand %p893_p8, %p889_p5 }
 0x462   : > { %897 = shalt.err (!%p894_p10)
}
 0x463   : > { %784 = dma.vmem_to_hbm [thread:$0]  (%p1053_p3), %s596_s20, 128, %s598_s29, %s583_s11  }
 0x464 PF: > { %p790_p11 = scmp.ge.s32.totalorder %s964_s28, 2  ;;  %s609_s13 = sand.u32 1, %s936_s21  }
 0x465   : > { %s610_s15 = scalar_lea.sflag [#allocation5], %s609_s13 }
 0x466   : > { %p787_p12 = pnand %p790_p11, %p1063_p9 }
 0x468   : > { %p788_p13 = pneg %p787_p12 }
 0x46a   : > { %931 = dma.done.wait (%p788_p13), %s610_s15, 128  }
 0x46b   : > { %933 = vsyncadd (%p788_p13), %s610_s15, 4294967168  ;;  %s19_s28 = sadd.s32 1, %s964_s28   ;;  %s1206_s7 = sld [smem:[#allocation11_spill]] }
 0x46c   : > { %p16_p0 = scmp.ge.s32.totalorder %s19_s28, 10   ;;  %s1207_s24 = sld [smem:[#allocation7_spill]] }
 0x46d   : > { %s1208_s25 = sld [smem:[#allocation8_spill]]  ;;  %s1211_s21 = smov %s940_s22 }
 0x46e   : > { %s1209_s26 = sld [smem:[#allocation9_spill]]  ;;  %s1212_s22 = smov %s944_s23 }
 0x46f   : > { %s1210_s27 = sld [smem:[#allocation10_spill]]  ;;  %18 = sbr.rel (!%p16_p0) target bundleno = 5 (0x5), region = 93 }
 0x471   : > { %s1213_s23 = smov %s1206_s7 }
 0x474   :  { %616 = vsyncpa [#allocation5], 1 }
 0x475   :  { %618 = vsyncpa [#allocation5 + $0x1], 1 }

</bundles_post_ra>
